<compile_context>
chip_gen: v5e
topology: v5e:2x2
jax: 0.10.0
libtpu: 0.0.40
codegen_flags: <defaults>
</compile_context>

<pallas_src>
import jax
import jax.numpy as jnp
from jax.experimental import pallas as pl
from jax.experimental.pallas import tpu as pltpu


def _round_up(n, m):
    return ((n + m - 1) // m) * m


# ---------------------------------------------------------------------------
# Model hyper-parameters (synthetic, small, consistent with the module)
# ---------------------------------------------------------------------------
BATCH = 2
AA_LEN = 8                      # aa_encoding_length (tokens fed to frozen encoder)
ESM_HIDDEN = 32                 # pretrained_model_aa.config.hidden_size
ESM_VOCAB = 24                  # frozen token-embedding table rows (ESM2 stand-in)
NT_WIN = 16
NT_ALPHA = 4
NT_ENC_LEN = NT_WIN * NT_ALPHA  # 64
VOCAB_SIZES = [11, 9, 8, 7, 6, 5, 4]   # species..kingdom
N_TAX = len(VOCAB_SIZES)
TAX_TOTAL = sum(VOCAB_SIZES)    # 50 (all 7 tables stacked)
EMB_SIZE_TAX = 8
HIDDEN_AA = 32
HIDDEN_NT = 32
HIDDEN_MERGE = 32
DEPTH_NT = 2                    # depth_nt_window
NUM_LABELS = 1
OUT_PAD = 128                   # lane-dense output width (col 0 = logit)

assert HIDDEN_AA == HIDDEN_NT == HIDDEN_MERGE, "packed weight slab assumes equal widths"
HIDDEN = HIDDEN_AA

# Packed hidden-weight slab layout (rows = in_features, 32 lanes = out_features):
W_AA_ROWS = ESM_HIDDEN * AA_LEN                        # 256  rows [0, 256)   : hidden_layer_aa
NT_IN_DIMS = [NT_ENC_LEN] + [HIDDEN_NT] * (DEPTH_NT - 1)   # [64, 32]          : nt_layers
NT_OFF = W_AA_ROWS
MERGE_IN = HIDDEN_AA + HIDDEN_NT + EMB_SIZE_TAX        # 72
MERGE_OFF = NT_OFF + sum(NT_IN_DIMS)                   # 352  rows [352, 424) : hidden_layer_2
W_HID_ROWS = MERGE_OFF + MERGE_IN                      # 424

# Packed bias slab rows: 0 = b_aa, 1..DEPTH_NT = nt biases, DEPTH_NT+1 = b_merge
MERGE_B_ROW = DEPTH_NT + 1
BIAS_ROWS = max(8, _round_up(MERGE_B_ROW + 1, 8))      # 8

# Classifier head slab rows: [0, 32) = W_cls (col 0), row 32 = b_cls (col 0)
HEAD_ROWS = _round_up(HIDDEN_MERGE + 1, 8)             # 40


# ---------------------------------------------------------------------------
# Pallas kernel: whole forward pass (embedding gathers included) for one batch tile.
# ---------------------------------------------------------------------------
def netstart_kernel(tok_ref, mask_ref, nt_ref, tax_ref,
                    esm_ref, tax_tbl_ref, w_hid_ref, b_hid_ref, head_ref,
                    out_ref):
    tb = tok_ref.shape[0]
    tok = tok_ref[...]                                  # (tb, AA_LEN) int32
    mask = mask_ref[...].astype(jnp.float32)            # (tb, AA_LEN)

    # ---- amino-acid branch --------------------------------------------------
    # frozen encoder stand-in (token-embedding gather as one-hot matmul), masked,
    # fused with hidden_layer_aa as AA_LEN accumulating MXU dots: this avoids any
    # in-kernel sublane->lane reshape of the flattened (tb, 256) features.
    esm_tbl = esm_ref[...]                              # (ESM_VOCAB, ESM_HIDDEN) bf16
    vocab_iota = jax.lax.broadcasted_iota(jnp.int32, (tb, ESM_VOCAB), 1)
    h_aa = jnp.zeros((tb, HIDDEN_AA), jnp.float32)
    for t in range(AA_LEN):
        onehot_t = (tok[:, t:t + 1] == vocab_iota).astype(jnp.float32)
        emb_t = jnp.dot(onehot_t.astype(jnp.bfloat16), esm_tbl,
                        preferred_element_type=jnp.float32)        # (tb, ESM_HIDDEN)
        emb_t = emb_t * mask[:, t:t + 1]                           # attention mask
        w_aa_t = w_hid_ref[t * ESM_HIDDEN:(t + 1) * ESM_HIDDEN, :]  # (32, 32) bf16
        h_aa = h_aa + jnp.dot(emb_t.astype(jnp.bfloat16), w_aa_t,
                              preferred_element_type=jnp.float32)
    h_aa = jnp.maximum(h_aa + b_hid_ref[0:1, :], 0.0)   # ReLU; dropout_1 = identity (eval)

    # ---- nucleotide branch --------------------------------------------------
    h_nt = nt_ref[...]                                  # (tb, NT_ENC_LEN) f32
    off = NT_OFF
    for li, in_dim in enumerate(NT_IN_DIMS):
        w = w_hid_ref[off:off + in_dim, :]              # bf16
        h_nt = jnp.dot(h_nt.astype(jnp.bfloat16), w, preferred_element_type=jnp.float32)
        h_nt = jnp.maximum(h_nt + b_hid_ref[1 + li:2 + li, :], 0.0)   # ReLU; dropout_1 identity
        off += in_dim

    # ---- taxonomy embeddings ------------------------------------------------
    # 7 embedding lookups (+ padding_idx=0 rows zeroed in the table) fused into a
    # single combined one-hot over the 50 stacked rows and one matmul.
    tax = tax_ref[...]                                  # (tb, N_TAX) int32
    tax_iota = jax.lax.broadcasted_iota(jnp.int32, (tb, TAX_TOTAL), 1)
    onehot = jnp.zeros((tb, TAX_TOTAL), jnp.float32)
    seg = 0
    for r, vs in enumerate(VOCAB_SIZES):
        onehot = onehot + ((tax[:, r:r + 1] + seg) == tax_iota).astype(jnp.float32)
        seg += vs
    tax_emb = jnp.dot(onehot.astype(jnp.bfloat16), tax_tbl_ref[...],
                      preferred_element_type=jnp.float32)          # (tb, EMB_SIZE_TAX)

    # ---- merge layer: lane-concat + single K=72 dot -------------------------
    merged_in = jnp.concatenate([h_aa, h_nt, tax_emb], axis=-1).astype(jnp.bfloat16)
    w_m = w_hid_ref[MERGE_OFF:MERGE_OFF + MERGE_IN, :]  # (72, 32) bf16
    h_m = jnp.dot(merged_in, w_m, preferred_element_type=jnp.float32)
    h_m = jnp.maximum(h_m + b_hid_ref[MERGE_B_ROW:MERGE_B_ROW + 1, :], 0.0)  # dropout_2 identity

    # ---- classifier head (lane-dense: 128 output columns, col 0 is the logit)
    w_cls = head_ref[0:HIDDEN_MERGE, :]                              # (32, 128) f32
    b_cls = head_ref[HIDDEN_MERGE:HIDDEN_MERGE + 1, :]               # (1, 128)  f32
    out_ref[...] = jnp.dot(h_m, w_cls, preferred_element_type=jnp.float32) + b_cls


# ---------------------------------------------------------------------------
# Wrapper: batch padding + single fused pallas_call.
# ---------------------------------------------------------------------------
def netstart_forward_pallas(x_aa_tokens, attention_mask_aa, nt_flat, tax_ranks, params):
    B = x_aa_tokens.shape[0]
    tile_b = 128 if B >= 128 else _round_up(B, 8)
    b_pad = _round_up(B, tile_b)

    def pad_b(x):
        if b_pad == B:
            return x
        return jnp.pad(x, ((0, b_pad - B),) + ((0, 0),) * (x.ndim - 1))

    tok = pad_b(x_aa_tokens.astype(jnp.int32))
    mask = pad_b(attention_mask_aa.astype(jnp.int32))
    nt = pad_b(nt_flat.astype(jnp.float32))
    tax = pad_b(tax_ranks.astype(jnp.int32))

    operands = (tok, mask, nt, tax,
                params["esm_table"], params["tax_table"],
                params["w_hid"], params["b_hid"], params["head"])

    def batch_spec(ncols):
        return pl.BlockSpec((tile_b, ncols), lambda i: (i, 0))

    def const_spec(arr):
        return pl.BlockSpec(arr.shape, lambda i: (0, 0))

    in_specs = [
        batch_spec(AA_LEN),                 # tokens
        batch_spec(AA_LEN),                 # attention mask
        batch_spec(NT_ENC_LEN),             # nt one-hot (flattened)
        batch_spec(N_TAX),                  # taxonomy ranks
        const_spec(params["esm_table"]),    # frozen encoder table (VMEM resident)
        const_spec(params["tax_table"]),    # stacked taxonomy tables
        const_spec(params["w_hid"]),        # packed hidden weights
        const_spec(params["b_hid"]),        # packed biases
        const_spec(params["head"]),         # classifier head (padded to 128 lanes)
    ]

    flops_per_row = 2 * (AA_LEN * (ESM_VOCAB * ESM_HIDDEN + ESM_HIDDEN * HIDDEN_AA)
                         + sum(d * HIDDEN_NT for d in NT_IN_DIMS)
                         + TAX_TOTAL * EMB_SIZE_TAX
                         + MERGE_IN * HIDDEN_MERGE
                         + HIDDEN_MERGE * OUT_PAD)
    bytes_accessed = sum(int(x.size) * x.dtype.itemsize for x in operands) + b_pad * OUT_PAD * 4

    out = pl.pallas_call(
        netstart_kernel,
        out_shape=jax.ShapeDtypeStruct((b_pad, OUT_PAD), jnp.float32),
        grid_spec=pltpu.PrefetchScalarGridSpec(
            num_scalar_prefetch=0,
            grid=(b_pad // tile_b,),
            in_specs=in_specs,
            out_specs=pl.BlockSpec((tile_b, OUT_PAD), lambda i: (i, 0)),
        ),
        compiler_params=pltpu.CompilerParams(
            dimension_semantics=("parallel",)),
        cost_estimate=pl.CostEstimate(flops=flops_per_row * b_pad,
                                      transcendentals=0,
                                      bytes_accessed=bytes_accessed),
    )(*operands)

    return out[:B, :NUM_LABELS]


def netstart_forward(params, x_aa_tokens, x_nt, attention_mask_aa, tax_ranks):
    """Full forward. Only a metadata reshape (+ optional batch pad) happens outside
    the single fused Pallas kernel."""
    nt_flat = x_nt.reshape(x_nt.shape[0], -1)
    return netstart_forward_pallas(x_aa_tokens, attention_mask_aa, nt_flat, tax_ranks, params)


# ---------------------------------------------------------------------------
# Parameter construction (deterministic) with packing into resident slabs.
# ---------------------------------------------------------------------------
def init_params(key):
    ks = iter(jax.random.split(key, 24))

    def nxt():
        return next(ks)

    def linear(in_f, out_f):
        w = jax.random.normal(nxt(), (in_f, out_f), jnp.float32) / jnp.sqrt(float(in_f))
        b = jax.random.normal(nxt(), (out_f,), jnp.float32) * 0.01
        return w, b

    # frozen "pretrained" token embedding table (stand-in for ESM2 last_hidden_state)
    esm_table = jax.random.normal(nxt(), (ESM_VOCAB, ESM_HIDDEN), jnp.float32) * 0.1

    w_aa, b_aa = linear(W_AA_ROWS, HIDDEN_AA)
    nt_ws, nt_bs = [], []
    for in_dim in NT_IN_DIMS:
        w, b = linear(in_dim, HIDDEN_NT)
        nt_ws.append(w)
        nt_bs.append(b)
    w_merge, b_merge = linear(MERGE_IN, HIDDEN_MERGE)
    w_cls, b_cls = linear(HIDDEN_MERGE, NUM_LABELS)

    # 7 taxonomy embedding tables, padding_idx=0 zeroed, stacked into one table
    tax_rows = []
    for vs in VOCAB_SIZES:
        t = jax.random.normal(nxt(), (vs, EMB_SIZE_TAX), jnp.float32) * 0.1
        tax_rows.append(t.at[0].set(0.0))
    tax_table = jnp.concatenate(tax_rows, axis=0)                 # (TAX_TOTAL, EMB_SIZE_TAX)

    # ---- pack into resident kernel slabs ----
    w_hid = jnp.concatenate([w_aa] + nt_ws + [w_merge], axis=0)   # (W_HID_ROWS, 32)

    b_hid = jnp.zeros((BIAS_ROWS, HIDDEN), jnp.float32)
    b_hid = b_hid.at[0].set(b_aa)
    for li, b in enumerate(nt_bs):
        b_hid = b_hid.at[1 + li].set(b)
    b_hid = b_hid.at[MERGE_B_ROW].set(b_merge)

    head = jnp.zeros((HEAD_ROWS, OUT_PAD), jnp.float32)
    head = head.at[:HIDDEN_MERGE, :NUM_LABELS].set(w_cls)
    head = head.at[HIDDEN_MERGE, :NUM_LABELS].set(b_cls)

    return {
        "esm_table": esm_table.astype(jnp.bfloat16),
        "tax_table": tax_table.astype(jnp.bfloat16),
        "w_hid": w_hid.astype(jnp.bfloat16),
        "b_hid": b_hid,              # biases kept f32 (bias-add/ReLU in f32; v5e-safe)
        "head": head,                # tiny classifier head kept f32, lane-padded to 128
    }


# ---------------------------------------------------------------------------
# Pure-JAX reference (same packed parameters) for a correctness check.
# ---------------------------------------------------------------------------
def netstart_reference(params, x_aa_tokens, x_nt, attention_mask_aa, tax_ranks):
    esm = params["esm_table"].astype(jnp.float32)
    w_hid = params["w_hid"].astype(jnp.float32)
    b_hid = params["b_hid"]
    head = params["head"]
    tax_tbl = params["tax_table"].astype(jnp.float32)

    seq = esm[x_aa_tokens] * attention_mask_aa[..., None].astype(jnp.float32)
    aa_flat = seq.reshape(seq.shape[0], -1)
    h_aa = jax.nn.relu(aa_flat @ w_hid[:W_AA_ROWS] + b_hid[0])

    h_nt = x_nt.reshape(x_nt.shape[0], -1).astype(jnp.float32)
    off = NT_OFF
    for li, in_dim in enumerate(NT_IN_DIMS):
        h_nt = jax.nn.relu(h_nt @ w_hid[off:off + in_dim] + b_hid[1 + li])
        off += in_dim

    tax_emb = jnp.zeros((x_aa_tokens.shape[0], EMB_SIZE_TAX), jnp.float32)
    seg = 0
    for r, vs in enumerate(VOCAB_SIZES):
        tax_emb = tax_emb + tax_tbl[seg + tax_ranks[:, r]]
        seg += vs

    merged = jnp.concatenate([h_aa, h_nt, tax_emb], axis=-1)
    h = jax.nn.relu(merged @ w_hid[MERGE_OFF:MERGE_OFF + MERGE_IN] + b_hid[MERGE_B_ROW])
    return h @ head[:HIDDEN_MERGE, :NUM_LABELS] + head[HIDDEN_MERGE, :NUM_LABELS]


# ---------------------------------------------------------------------------
if __name__ == "__main__":
    key = jax.random.PRNGKey(0)
    k_params, k_aa, k_nt, k_tax = jax.random.split(key, 4)

    params = init_params(k_params)

    # example inputs (small shapes consistent with the module's forward)
    x_aa_tokens = jax.random.randint(k_aa, (BATCH, AA_LEN), 0, ESM_VOCAB, dtype=jnp.int32)
    x_nt = jax.random.bernoulli(k_nt, 0.25, (BATCH, NT_WIN, NT_ALPHA)).astype(jnp.float32)
    attention_mask_aa = jnp.ones((BATCH, AA_LEN), dtype=jnp.int32)
    tax_ranks = jnp.stack(
        [jax.random.randint(jax.random.fold_in(k_tax, r), (BATCH,), 0, VOCAB_SIZES[r],
                            dtype=jnp.int32)
         for r in range(N_TAX)], axis=1)                                   # (B, 7)

    out = netstart_forward(params, x_aa_tokens, x_nt, attention_mask_aa, tax_ranks)
    out = jax.block_until_ready(out)
    assert out.shape == (BATCH, NUM_LABELS) and out.dtype == jnp.float32

    ref = netstart_reference(params, x_aa_tokens, x_nt, attention_mask_aa, tax_ranks)
    assert jnp.allclose(out, ref, atol=2e-2, rtol=2e-2), (out, ref)

    print("KERNEL_OK")
</pallas_src>

<mosaic_0001>
module attributes {stable_mosaic.version = 11 : i64} {
  func.func @netstart_kernel(%arg0: i32, %arg1: memref<8x8xi32, #tpu.memory_space<vmem>>, %arg2: memref<8x8xi32, #tpu.memory_space<vmem>>, %arg3: memref<8x64xf32, #tpu.memory_space<vmem>>, %arg4: memref<8x7xi32, #tpu.memory_space<vmem>>, %arg5: memref<24x32xbf16, #tpu.memory_space<vmem>>, %arg6: memref<50x8xbf16, #tpu.memory_space<vmem>>, %arg7: memref<424x32xbf16, #tpu.memory_space<vmem>>, %arg8: memref<8x32xf32, #tpu.memory_space<vmem>>, %arg9: memref<40x128xf32, #tpu.memory_space<vmem>>, %arg10: memref<8x128xf32, #tpu.memory_space<vmem>>) attributes {dimension_semantics = [#tpu.dimension_semantics<parallel>], iteration_bounds = array<i64: 1>, scalar_prefetch = 0 : i64, scratch_operands = 0 : i64, tpu.core_type = #tpu.core_type<tc>, window_params = [{transform_indices = @transform_0, window_bounds = array<i64: 8, 8>}, {transform_indices = @transform_1, window_bounds = array<i64: 8, 8>}, {transform_indices = @transform_2, window_bounds = array<i64: 8, 64>}, {transform_indices = @transform_3, window_bounds = array<i64: 8, 7>}, {pipeline_mode = #tpu.pipeline_mode<synchronous>, transform_indices = @transform_4, window_bounds = array<i64: 24, 32>}, {pipeline_mode = #tpu.pipeline_mode<synchronous>, transform_indices = @transform_5, window_bounds = array<i64: 50, 8>}, {pipeline_mode = #tpu.pipeline_mode<synchronous>, transform_indices = @transform_6, window_bounds = array<i64: 424, 32>}, {pipeline_mode = #tpu.pipeline_mode<synchronous>, transform_indices = @transform_7, window_bounds = array<i64: 8, 32>}, {pipeline_mode = #tpu.pipeline_mode<synchronous>, transform_indices = @transform_8, window_bounds = array<i64: 40, 128>}, {transform_indices = @transform_9, window_bounds = array<i64: 8, 128>}]} {
    %c0 = arith.constant 0 : index
    %c0_0 = arith.constant 0 : index
    %0 = vector.load %arg1[%c0, %c0_0] : memref<8x8xi32, #tpu.memory_space<vmem>>, vector<8x8xi32>
    %c0_1 = arith.constant 0 : index
    %c0_2 = arith.constant 0 : index
    %1 = vector.load %arg2[%c0_1, %c0_2] : memref<8x8xi32, #tpu.memory_space<vmem>>, vector<8x8xi32>
    %2 = arith.sitofp %1 : vector<8x8xi32> to vector<8x8xf32>
    %c0_3 = arith.constant 0 : index
    %c0_4 = arith.constant 0 : index
    %3 = vector.load %arg5[%c0_3, %c0_4] : memref<24x32xbf16, #tpu.memory_space<vmem>>, vector<24x32xbf16>
    %4 = tpu.iota {dimensions = array<i32: 1>} : vector<8x24xi32>
    %cst = arith.constant 0.000000e+00 : f32
    %5 = vector.broadcast %cst : f32 to vector<8x32xf32>
    %6 = vector.extract_strided_slice %0 {offsets = [0, 0], sizes = [8, 1], strides = [1, 1]} : vector<8x8xi32> to vector<8x1xi32>
    %7 = vector.broadcast %6 : vector<8x1xi32> to vector<8x24xi32>
    %8 = arith.cmpi eq, %7, %4 : vector<8x24xi32>
    %9 = arith.extui %8 : vector<8x24xi1> to vector<8x24xi32>
    %10 = arith.sitofp %9 : vector<8x24xi32> to vector<8x24xf32>
    %11 = arith.truncf %10 : vector<8x24xf32> to vector<8x24xbf16>
    %cst_5 = arith.constant dense<0.000000e+00> : vector<8x32xf32>
    %12 = tpu.matmul %11, %3, %cst_5 {dimension_numbers = #tpu.dot_dimension_numbers<[1], [0], [0], [1], [0, 0, 1, 1], [], []>} : vector<8x24xbf16>, vector<24x32xbf16>, vector<8x32xf32> -> vector<8x32xf32>
    %13 = vector.extract_strided_slice %2 {offsets = [0, 0], sizes = [8, 1], strides = [1, 1]} : vector<8x8xf32> to vector<8x1xf32>
    %14 = vector.broadcast %13 : vector<8x1xf32> to vector<8x32xf32>
    %15 = arith.mulf %12, %14 : vector<8x32xf32>
    %c0_6 = arith.constant 0 : index
    %c0_7 = arith.constant 0 : index
    %16 = vector.load %arg7[%c0_6, %c0_7] : memref<424x32xbf16, #tpu.memory_space<vmem>>, vector<32x32xbf16>
    %17 = arith.truncf %15 : vector<8x32xf32> to vector<8x32xbf16>
    %cst_8 = arith.constant dense<0.000000e+00> : vector<8x32xf32>
    %18 = tpu.matmul %17, %16, %cst_8 {dimension_numbers = #tpu.dot_dimension_numbers<[1], [0], [0], [1], [0, 0, 1, 1], [], []>} : vector<8x32xbf16>, vector<32x32xbf16>, vector<8x32xf32> -> vector<8x32xf32>
    %19 = arith.addf %5, %18 : vector<8x32xf32>
    %20 = vector.extract_strided_slice %0 {offsets = [0, 1], sizes = [8, 1], strides = [1, 1]} : vector<8x8xi32> to vector<8x1xi32>
    %21 = vector.broadcast %20 : vector<8x1xi32> to vector<8x24xi32>
    %22 = arith.cmpi eq, %21, %4 : vector<8x24xi32>
    %23 = arith.extui %22 : vector<8x24xi1> to vector<8x24xi32>
    %24 = arith.sitofp %23 : vector<8x24xi32> to vector<8x24xf32>
    %25 = arith.truncf %24 : vector<8x24xf32> to vector<8x24xbf16>
    %cst_9 = arith.constant dense<0.000000e+00> : vector<8x32xf32>
    %26 = tpu.matmul %25, %3, %cst_9 {dimension_numbers = #tpu.dot_dimension_numbers<[1], [0], [0], [1], [0, 0, 1, 1], [], []>} : vector<8x24xbf16>, vector<24x32xbf16>, vector<8x32xf32> -> vector<8x32xf32>
    %27 = vector.extract_strided_slice %2 {offsets = [0, 1], sizes = [8, 1], strides = [1, 1]} : vector<8x8xf32> to vector<8x1xf32>
    %28 = vector.broadcast %27 : vector<8x1xf32> to vector<8x32xf32>
    %29 = arith.mulf %26, %28 : vector<8x32xf32>
    %c32 = arith.constant 32 : index
    %c0_10 = arith.constant 0 : index
    %30 = vector.load %arg7[%c32, %c0_10] : memref<424x32xbf16, #tpu.memory_space<vmem>>, vector<32x32xbf16>
    %31 = arith.truncf %29 : vector<8x32xf32> to vector<8x32xbf16>
    %cst_11 = arith.constant dense<0.000000e+00> : vector<8x32xf32>
    %32 = tpu.matmul %31, %30, %cst_11 {dimension_numbers = #tpu.dot_dimension_numbers<[1], [0], [0], [1], [0, 0, 1, 1], [], []>} : vector<8x32xbf16>, vector<32x32xbf16>, vector<8x32xf32> -> vector<8x32xf32>
    %33 = arith.addf %19, %32 : vector<8x32xf32>
    %34 = vector.extract_strided_slice %0 {offsets = [0, 2], sizes = [8, 1], strides = [1, 1]} : vector<8x8xi32> to vector<8x1xi32>
    %35 = vector.broadcast %34 : vector<8x1xi32> to vector<8x24xi32>
    %36 = arith.cmpi eq, %35, %4 : vector<8x24xi32>
    %37 = arith.extui %36 : vector<8x24xi1> to vector<8x24xi32>
    %38 = arith.sitofp %37 : vector<8x24xi32> to vector<8x24xf32>
    %39 = arith.truncf %38 : vector<8x24xf32> to vector<8x24xbf16>
    %cst_12 = arith.constant dense<0.000000e+00> : vector<8x32xf32>
    %40 = tpu.matmul %39, %3, %cst_12 {dimension_numbers = #tpu.dot_dimension_numbers<[1], [0], [0], [1], [0, 0, 1, 1], [], []>} : vector<8x24xbf16>, vector<24x32xbf16>, vector<8x32xf32> -> vector<8x32xf32>
    %41 = vector.extract_strided_slice %2 {offsets = [0, 2], sizes = [8, 1], strides = [1, 1]} : vector<8x8xf32> to vector<8x1xf32>
    %42 = vector.broadcast %41 : vector<8x1xf32> to vector<8x32xf32>
    %43 = arith.mulf %40, %42 : vector<8x32xf32>
    %c64 = arith.constant 64 : index
    %c0_13 = arith.constant 0 : index
    %44 = vector.load %arg7[%c64, %c0_13] : memref<424x32xbf16, #tpu.memory_space<vmem>>, vector<32x32xbf16>
    %45 = arith.truncf %43 : vector<8x32xf32> to vector<8x32xbf16>
    %cst_14 = arith.constant dense<0.000000e+00> : vector<8x32xf32>
    %46 = tpu.matmul %45, %44, %cst_14 {dimension_numbers = #tpu.dot_dimension_numbers<[1], [0], [0], [1], [0, 0, 1, 1], [], []>} : vector<8x32xbf16>, vector<32x32xbf16>, vector<8x32xf32> -> vector<8x32xf32>
    %47 = arith.addf %33, %46 : vector<8x32xf32>
    %48 = vector.extract_strided_slice %0 {offsets = [0, 3], sizes = [8, 1], strides = [1, 1]} : vector<8x8xi32> to vector<8x1xi32>
    %49 = vector.broadcast %48 : vector<8x1xi32> to vector<8x24xi32>
    %50 = arith.cmpi eq, %49, %4 : vector<8x24xi32>
    %51 = arith.extui %50 : vector<8x24xi1> to vector<8x24xi32>
    %52 = arith.sitofp %51 : vector<8x24xi32> to vector<8x24xf32>
    %53 = arith.truncf %52 : vector<8x24xf32> to vector<8x24xbf16>
    %cst_15 = arith.constant dense<0.000000e+00> : vector<8x32xf32>
    %54 = tpu.matmul %53, %3, %cst_15 {dimension_numbers = #tpu.dot_dimension_numbers<[1], [0], [0], [1], [0, 0, 1, 1], [], []>} : vector<8x24xbf16>, vector<24x32xbf16>, vector<8x32xf32> -> vector<8x32xf32>
    %55 = vector.extract_strided_slice %2 {offsets = [0, 3], sizes = [8, 1], strides = [1, 1]} : vector<8x8xf32> to vector<8x1xf32>
    %56 = vector.broadcast %55 : vector<8x1xf32> to vector<8x32xf32>
    %57 = arith.mulf %54, %56 : vector<8x32xf32>
    %c96 = arith.constant 96 : index
    %c0_16 = arith.constant 0 : index
    %58 = vector.load %arg7[%c96, %c0_16] : memref<424x32xbf16, #tpu.memory_space<vmem>>, vector<32x32xbf16>
    %59 = arith.truncf %57 : vector<8x32xf32> to vector<8x32xbf16>
    %cst_17 = arith.constant dense<0.000000e+00> : vector<8x32xf32>
    %60 = tpu.matmul %59, %58, %cst_17 {dimension_numbers = #tpu.dot_dimension_numbers<[1], [0], [0], [1], [0, 0, 1, 1], [], []>} : vector<8x32xbf16>, vector<32x32xbf16>, vector<8x32xf32> -> vector<8x32xf32>
    %61 = arith.addf %47, %60 : vector<8x32xf32>
    %62 = vector.extract_strided_slice %0 {offsets = [0, 4], sizes = [8, 1], strides = [1, 1]} : vector<8x8xi32> to vector<8x1xi32>
    %63 = vector.broadcast %62 : vector<8x1xi32> to vector<8x24xi32>
    %64 = arith.cmpi eq, %63, %4 : vector<8x24xi32>
    %65 = arith.extui %64 : vector<8x24xi1> to vector<8x24xi32>
    %66 = arith.sitofp %65 : vector<8x24xi32> to vector<8x24xf32>
    %67 = arith.truncf %66 : vector<8x24xf32> to vector<8x24xbf16>
    %cst_18 = arith.constant dense<0.000000e+00> : vector<8x32xf32>
    %68 = tpu.matmul %67, %3, %cst_18 {dimension_numbers = #tpu.dot_dimension_numbers<[1], [0], [0], [1], [0, 0, 1, 1], [], []>} : vector<8x24xbf16>, vector<24x32xbf16>, vector<8x32xf32> -> vector<8x32xf32>
    %69 = vector.extract_strided_slice %2 {offsets = [0, 4], sizes = [8, 1], strides = [1, 1]} : vector<8x8xf32> to vector<8x1xf32>
    %70 = vector.broadcast %69 : vector<8x1xf32> to vector<8x32xf32>
    %71 = arith.mulf %68, %70 : vector<8x32xf32>
    %c128 = arith.constant 128 : index
    %c0_19 = arith.constant 0 : index
    %72 = vector.load %arg7[%c128, %c0_19] : memref<424x32xbf16, #tpu.memory_space<vmem>>, vector<32x32xbf16>
    %73 = arith.truncf %71 : vector<8x32xf32> to vector<8x32xbf16>
    %cst_20 = arith.constant dense<0.000000e+00> : vector<8x32xf32>
    %74 = tpu.matmul %73, %72, %cst_20 {dimension_numbers = #tpu.dot_dimension_numbers<[1], [0], [0], [1], [0, 0, 1, 1], [], []>} : vector<8x32xbf16>, vector<32x32xbf16>, vector<8x32xf32> -> vector<8x32xf32>
    %75 = arith.addf %61, %74 : vector<8x32xf32>
    %76 = vector.extract_strided_slice %0 {offsets = [0, 5], sizes = [8, 1], strides = [1, 1]} : vector<8x8xi32> to vector<8x1xi32>
    %77 = vector.broadcast %76 : vector<8x1xi32> to vector<8x24xi32>
    %78 = arith.cmpi eq, %77, %4 : vector<8x24xi32>
    %79 = arith.extui %78 : vector<8x24xi1> to vector<8x24xi32>
    %80 = arith.sitofp %79 : vector<8x24xi32> to vector<8x24xf32>
    %81 = arith.truncf %80 : vector<8x24xf32> to vector<8x24xbf16>
    %cst_21 = arith.constant dense<0.000000e+00> : vector<8x32xf32>
    %82 = tpu.matmul %81, %3, %cst_21 {dimension_numbers = #tpu.dot_dimension_numbers<[1], [0], [0], [1], [0, 0, 1, 1], [], []>} : vector<8x24xbf16>, vector<24x32xbf16>, vector<8x32xf32> -> vector<8x32xf32>
    %83 = vector.extract_strided_slice %2 {offsets = [0, 5], sizes = [8, 1], strides = [1, 1]} : vector<8x8xf32> to vector<8x1xf32>
    %84 = vector.broadcast %83 : vector<8x1xf32> to vector<8x32xf32>
    %85 = arith.mulf %82, %84 : vector<8x32xf32>
    %c160 = arith.constant 160 : index
    %c0_22 = arith.constant 0 : index
    %86 = vector.load %arg7[%c160, %c0_22] : memref<424x32xbf16, #tpu.memory_space<vmem>>, vector<32x32xbf16>
    %87 = arith.truncf %85 : vector<8x32xf32> to vector<8x32xbf16>
    %cst_23 = arith.constant dense<0.000000e+00> : vector<8x32xf32>
    %88 = tpu.matmul %87, %86, %cst_23 {dimension_numbers = #tpu.dot_dimension_numbers<[1], [0], [0], [1], [0, 0, 1, 1], [], []>} : vector<8x32xbf16>, vector<32x32xbf16>, vector<8x32xf32> -> vector<8x32xf32>
    %89 = arith.addf %75, %88 : vector<8x32xf32>
    %90 = vector.extract_strided_slice %0 {offsets = [0, 6], sizes = [8, 1], strides = [1, 1]} : vector<8x8xi32> to vector<8x1xi32>
    %91 = vector.broadcast %90 : vector<8x1xi32> to vector<8x24xi32>
    %92 = arith.cmpi eq, %91, %4 : vector<8x24xi32>
    %93 = arith.extui %92 : vector<8x24xi1> to vector<8x24xi32>
    %94 = arith.sitofp %93 : vector<8x24xi32> to vector<8x24xf32>
    %95 = arith.truncf %94 : vector<8x24xf32> to vector<8x24xbf16>
    %cst_24 = arith.constant dense<0.000000e+00> : vector<8x32xf32>
    %96 = tpu.matmul %95, %3, %cst_24 {dimension_numbers = #tpu.dot_dimension_numbers<[1], [0], [0], [1], [0, 0, 1, 1], [], []>} : vector<8x24xbf16>, vector<24x32xbf16>, vector<8x32xf32> -> vector<8x32xf32>
    %97 = vector.extract_strided_slice %2 {offsets = [0, 6], sizes = [8, 1], strides = [1, 1]} : vector<8x8xf32> to vector<8x1xf32>
    %98 = vector.broadcast %97 : vector<8x1xf32> to vector<8x32xf32>
    %99 = arith.mulf %96, %98 : vector<8x32xf32>
    %c192 = arith.constant 192 : index
    %c0_25 = arith.constant 0 : index
    %100 = vector.load %arg7[%c192, %c0_25] : memref<424x32xbf16, #tpu.memory_space<vmem>>, vector<32x32xbf16>
    %101 = arith.truncf %99 : vector<8x32xf32> to vector<8x32xbf16>
    %cst_26 = arith.constant dense<0.000000e+00> : vector<8x32xf32>
    %102 = tpu.matmul %101, %100, %cst_26 {dimension_numbers = #tpu.dot_dimension_numbers<[1], [0], [0], [1], [0, 0, 1, 1], [], []>} : vector<8x32xbf16>, vector<32x32xbf16>, vector<8x32xf32> -> vector<8x32xf32>
    %103 = arith.addf %89, %102 : vector<8x32xf32>
    %104 = vector.extract_strided_slice %0 {offsets = [0, 7], sizes = [8, 1], strides = [1, 1]} : vector<8x8xi32> to vector<8x1xi32>
    %105 = vector.broadcast %104 : vector<8x1xi32> to vector<8x24xi32>
    %106 = arith.cmpi eq, %105, %4 : vector<8x24xi32>
    %107 = arith.extui %106 : vector<8x24xi1> to vector<8x24xi32>
    %108 = arith.sitofp %107 : vector<8x24xi32> to vector<8x24xf32>
    %109 = arith.truncf %108 : vector<8x24xf32> to vector<8x24xbf16>
    %cst_27 = arith.constant dense<0.000000e+00> : vector<8x32xf32>
    %110 = tpu.matmul %109, %3, %cst_27 {dimension_numbers = #tpu.dot_dimension_numbers<[1], [0], [0], [1], [0, 0, 1, 1], [], []>} : vector<8x24xbf16>, vector<24x32xbf16>, vector<8x32xf32> -> vector<8x32xf32>
    %111 = vector.extract_strided_slice %2 {offsets = [0, 7], sizes = [8, 1], strides = [1, 1]} : vector<8x8xf32> to vector<8x1xf32>
    %112 = vector.broadcast %111 : vector<8x1xf32> to vector<8x32xf32>
    %113 = arith.mulf %110, %112 : vector<8x32xf32>
    %c224 = arith.constant 224 : index
    %c0_28 = arith.constant 0 : index
    %114 = vector.load %arg7[%c224, %c0_28] : memref<424x32xbf16, #tpu.memory_space<vmem>>, vector<32x32xbf16>
    %115 = arith.truncf %113 : vector<8x32xf32> to vector<8x32xbf16>
    %cst_29 = arith.constant dense<0.000000e+00> : vector<8x32xf32>
    %116 = tpu.matmul %115, %114, %cst_29 {dimension_numbers = #tpu.dot_dimension_numbers<[1], [0], [0], [1], [0, 0, 1, 1], [], []>} : vector<8x32xbf16>, vector<32x32xbf16>, vector<8x32xf32> -> vector<8x32xf32>
    %117 = arith.addf %103, %116 : vector<8x32xf32>
    %c0_30 = arith.constant 0 : index
    %c0_31 = arith.constant 0 : index
    %118 = vector.load %arg8[%c0_30, %c0_31] : memref<8x32xf32, #tpu.memory_space<vmem>>, vector<1x32xf32>
    %119 = vector.broadcast %118 : vector<1x32xf32> to vector<8x32xf32>
    %120 = arith.addf %117, %119 : vector<8x32xf32>
    %cst_32 = arith.constant 0.000000e+00 : f32
    %121 = vector.broadcast %cst_32 : f32 to vector<8x32xf32>
    %122 = arith.maximumf %120, %121 : vector<8x32xf32>
    %c0_33 = arith.constant 0 : index
    %c0_34 = arith.constant 0 : index
    %123 = vector.load %arg3[%c0_33, %c0_34] : memref<8x64xf32, #tpu.memory_space<vmem>>, vector<8x64xf32>
    %c256 = arith.constant 256 : index
    %c0_35 = arith.constant 0 : index
    %124 = vector.load %arg7[%c256, %c0_35] : memref<424x32xbf16, #tpu.memory_space<vmem>>, vector<64x32xbf16>
    %125 = arith.truncf %123 : vector<8x64xf32> to vector<8x64xbf16>
    %cst_36 = arith.constant dense<0.000000e+00> : vector<8x32xf32>
    %126 = tpu.matmul %125, %124, %cst_36 {dimension_numbers = #tpu.dot_dimension_numbers<[1], [0], [0], [1], [0, 0, 1, 1], [], []>} : vector<8x64xbf16>, vector<64x32xbf16>, vector<8x32xf32> -> vector<8x32xf32>
    %c1 = arith.constant 1 : index
    %c0_37 = arith.constant 0 : index
    %127 = vector.load %arg8[%c1, %c0_37] : memref<8x32xf32, #tpu.memory_space<vmem>>, vector<1x32xf32>
    %128 = vector.broadcast %127 : vector<1x32xf32> to vector<8x32xf32>
    %129 = arith.addf %126, %128 : vector<8x32xf32>
    %cst_38 = arith.constant 0.000000e+00 : f32
    %130 = vector.broadcast %cst_38 : f32 to vector<8x32xf32>
    %131 = arith.maximumf %129, %130 : vector<8x32xf32>
    %c320 = arith.constant 320 : index
    %c0_39 = arith.constant 0 : index
    %132 = vector.load %arg7[%c320, %c0_39] : memref<424x32xbf16, #tpu.memory_space<vmem>>, vector<32x32xbf16>
    %133 = arith.truncf %131 : vector<8x32xf32> to vector<8x32xbf16>
    %cst_40 = arith.constant dense<0.000000e+00> : vector<8x32xf32>
    %134 = tpu.matmul %133, %132, %cst_40 {dimension_numbers = #tpu.dot_dimension_numbers<[1], [0], [0], [1], [0, 0, 1, 1], [], []>} : vector<8x32xbf16>, vector<32x32xbf16>, vector<8x32xf32> -> vector<8x32xf32>
    %c2 = arith.constant 2 : index
    %c0_41 = arith.constant 0 : index
    %135 = vector.load %arg8[%c2, %c0_41] : memref<8x32xf32, #tpu.memory_space<vmem>>, vector<1x32xf32>
    %136 = vector.broadcast %135 : vector<1x32xf32> to vector<8x32xf32>
    %137 = arith.addf %134, %136 : vector<8x32xf32>
    %cst_42 = arith.constant 0.000000e+00 : f32
    %138 = vector.broadcast %cst_42 : f32 to vector<8x32xf32>
    %139 = arith.maximumf %137, %138 : vector<8x32xf32>
    %c0_43 = arith.constant 0 : index
    %c0_44 = arith.constant 0 : index
    %140 = vector.load %arg4[%c0_43, %c0_44] : memref<8x7xi32, #tpu.memory_space<vmem>>, vector<8x7xi32>
    %141 = tpu.iota {dimensions = array<i32: 1>} : vector<8x50xi32>
    %cst_45 = arith.constant 0.000000e+00 : f32
    %142 = vector.broadcast %cst_45 : f32 to vector<8x50xf32>
    %143 = vector.extract_strided_slice %140 {offsets = [0, 0], sizes = [8, 1], strides = [1, 1]} : vector<8x7xi32> to vector<8x1xi32>
    %c0_i32 = arith.constant 0 : i32
    %144 = vector.broadcast %c0_i32 : i32 to vector<8x1xi32>
    %145 = arith.addi %143, %144 : vector<8x1xi32>
    %146 = vector.broadcast %145 : vector<8x1xi32> to vector<8x50xi32>
    %147 = arith.cmpi eq, %146, %141 : vector<8x50xi32>
    %148 = arith.extui %147 : vector<8x50xi1> to vector<8x50xi32>
    %149 = arith.sitofp %148 : vector<8x50xi32> to vector<8x50xf32>
    %150 = arith.addf %142, %149 : vector<8x50xf32>
    %151 = vector.extract_strided_slice %140 {offsets = [0, 1], sizes = [8, 1], strides = [1, 1]} : vector<8x7xi32> to vector<8x1xi32>
    %c11_i32 = arith.constant 11 : i32
    %152 = vector.broadcast %c11_i32 : i32 to vector<8x1xi32>
    %153 = arith.addi %151, %152 : vector<8x1xi32>
    %154 = vector.broadcast %153 : vector<8x1xi32> to vector<8x50xi32>
    %155 = arith.cmpi eq, %154, %141 : vector<8x50xi32>
    %156 = arith.extui %155 : vector<8x50xi1> to vector<8x50xi32>
    %157 = arith.sitofp %156 : vector<8x50xi32> to vector<8x50xf32>
    %158 = arith.addf %150, %157 : vector<8x50xf32>
    %159 = vector.extract_strided_slice %140 {offsets = [0, 2], sizes = [8, 1], strides = [1, 1]} : vector<8x7xi32> to vector<8x1xi32>
    %c20_i32 = arith.constant 20 : i32
    %160 = vector.broadcast %c20_i32 : i32 to vector<8x1xi32>
    %161 = arith.addi %159, %160 : vector<8x1xi32>
    %162 = vector.broadcast %161 : vector<8x1xi32> to vector<8x50xi32>
    %163 = arith.cmpi eq, %162, %141 : vector<8x50xi32>
    %164 = arith.extui %163 : vector<8x50xi1> to vector<8x50xi32>
    %165 = arith.sitofp %164 : vector<8x50xi32> to vector<8x50xf32>
    %166 = arith.addf %158, %165 : vector<8x50xf32>
    %167 = vector.extract_strided_slice %140 {offsets = [0, 3], sizes = [8, 1], strides = [1, 1]} : vector<8x7xi32> to vector<8x1xi32>
    %c28_i32 = arith.constant 28 : i32
    %168 = vector.broadcast %c28_i32 : i32 to vector<8x1xi32>
    %169 = arith.addi %167, %168 : vector<8x1xi32>
    %170 = vector.broadcast %169 : vector<8x1xi32> to vector<8x50xi32>
    %171 = arith.cmpi eq, %170, %141 : vector<8x50xi32>
    %172 = arith.extui %171 : vector<8x50xi1> to vector<8x50xi32>
    %173 = arith.sitofp %172 : vector<8x50xi32> to vector<8x50xf32>
    %174 = arith.addf %166, %173 : vector<8x50xf32>
    %175 = vector.extract_strided_slice %140 {offsets = [0, 4], sizes = [8, 1], strides = [1, 1]} : vector<8x7xi32> to vector<8x1xi32>
    %c35_i32 = arith.constant 35 : i32
    %176 = vector.broadcast %c35_i32 : i32 to vector<8x1xi32>
    %177 = arith.addi %175, %176 : vector<8x1xi32>
    %178 = vector.broadcast %177 : vector<8x1xi32> to vector<8x50xi32>
    %179 = arith.cmpi eq, %178, %141 : vector<8x50xi32>
    %180 = arith.extui %179 : vector<8x50xi1> to vector<8x50xi32>
    %181 = arith.sitofp %180 : vector<8x50xi32> to vector<8x50xf32>
    %182 = arith.addf %174, %181 : vector<8x50xf32>
    %183 = vector.extract_strided_slice %140 {offsets = [0, 5], sizes = [8, 1], strides = [1, 1]} : vector<8x7xi32> to vector<8x1xi32>
    %c41_i32 = arith.constant 41 : i32
    %184 = vector.broadcast %c41_i32 : i32 to vector<8x1xi32>
    %185 = arith.addi %183, %184 : vector<8x1xi32>
    %186 = vector.broadcast %185 : vector<8x1xi32> to vector<8x50xi32>
    %187 = arith.cmpi eq, %186, %141 : vector<8x50xi32>
    %188 = arith.extui %187 : vector<8x50xi1> to vector<8x50xi32>
    %189 = arith.sitofp %188 : vector<8x50xi32> to vector<8x50xf32>
    %190 = arith.addf %182, %189 : vector<8x50xf32>
    %191 = vector.extract_strided_slice %140 {offsets = [0, 6], sizes = [8, 1], strides = [1, 1]} : vector<8x7xi32> to vector<8x1xi32>
    %c46_i32 = arith.constant 46 : i32
    %192 = vector.broadcast %c46_i32 : i32 to vector<8x1xi32>
    %193 = arith.addi %191, %192 : vector<8x1xi32>
    %194 = vector.broadcast %193 : vector<8x1xi32> to vector<8x50xi32>
    %195 = arith.cmpi eq, %194, %141 : vector<8x50xi32>
    %196 = arith.extui %195 : vector<8x50xi1> to vector<8x50xi32>
    %197 = arith.sitofp %196 : vector<8x50xi32> to vector<8x50xf32>
    %198 = arith.addf %190, %197 : vector<8x50xf32>
    %199 = arith.truncf %198 : vector<8x50xf32> to vector<8x50xbf16>
    %c0_46 = arith.constant 0 : index
    %c0_47 = arith.constant 0 : index
    %200 = vector.load %arg6[%c0_46, %c0_47] : memref<50x8xbf16, #tpu.memory_space<vmem>>, vector<50x8xbf16>
    %cst_48 = arith.constant dense<0.000000e+00> : vector<8x8xf32>
    %201 = tpu.matmul %199, %200, %cst_48 {dimension_numbers = #tpu.dot_dimension_numbers<[1], [0], [0], [1], [0, 0, 1, 1], [], []>} : vector<8x50xbf16>, vector<50x8xbf16>, vector<8x8xf32> -> vector<8x8xf32>
    %202 = tpu.concatenate %122, %139, %201 in 1 : vector<8x32xf32>, vector<8x32xf32>, vector<8x8xf32> -> vector<8x72xf32>
    %203 = arith.truncf %202 : vector<8x72xf32> to vector<8x72xbf16>
    %c352 = arith.constant 352 : index
    %c0_49 = arith.constant 0 : index
    %204 = vector.load %arg7[%c352, %c0_49] : memref<424x32xbf16, #tpu.memory_space<vmem>>, vector<72x32xbf16>
    %cst_50 = arith.constant dense<0.000000e+00> : vector<8x32xf32>
    %205 = tpu.matmul %203, %204, %cst_50 {dimension_numbers = #tpu.dot_dimension_numbers<[1], [0], [0], [1], [0, 0, 1, 1], [], []>} : vector<8x72xbf16>, vector<72x32xbf16>, vector<8x32xf32> -> vector<8x32xf32>
    %c3 = arith.constant 3 : index
    %c0_51 = arith.constant 0 : index
    %206 = vector.load %arg8[%c3, %c0_51] : memref<8x32xf32, #tpu.memory_space<vmem>>, vector<1x32xf32>
    %207 = vector.broadcast %206 : vector<1x32xf32> to vector<8x32xf32>
    %208 = arith.addf %205, %207 : vector<8x32xf32>
    %cst_52 = arith.constant 0.000000e+00 : f32
    %209 = vector.broadcast %cst_52 : f32 to vector<8x32xf32>
    %210 = arith.maximumf %208, %209 : vector<8x32xf32>
    %c0_53 = arith.constant 0 : index
    %c0_54 = arith.constant 0 : index
    %211 = vector.load %arg9[%c0_53, %c0_54] : memref<40x128xf32, #tpu.memory_space<vmem>>, vector<32x128xf32>
    %c32_55 = arith.constant 32 : index
    %c0_56 = arith.constant 0 : index
    %212 = vector.load %arg9[%c32_55, %c0_56] : memref<40x128xf32, #tpu.memory_space<vmem>>, vector<1x128xf32>
    %cst_57 = arith.constant dense<0.000000e+00> : vector<8x128xf32>
    %213 = tpu.matmul %210, %211, %cst_57 {dimension_numbers = #tpu.dot_dimension_numbers<[1], [0], [0], [1], [0, 0, 1, 1], [], []>} : vector<8x32xf32>, vector<32x128xf32>, vector<8x128xf32> -> vector<8x128xf32>
    %214 = vector.broadcast %212 : vector<1x128xf32> to vector<8x128xf32>
    %215 = arith.addf %213, %214 : vector<8x128xf32>
    %c0_58 = arith.constant 0 : index
    %c0_59 = arith.constant 0 : index
    %216 = vector.load %arg10[%c0_58, %c0_59] : memref<8x128xf32, #tpu.memory_space<vmem>>, vector<8x128xf32>
    tpu.vector_store %arg10[%c0_58, %c0_59], %215 {strides = array<i32>} : memref<8x128xf32, #tpu.memory_space<vmem>>, vector<8x128xf32>,
    return
  }
  func.func @transform_0(%arg0: i32) -> (i32, i32) {
    %c0_i32 = arith.constant 0 : i32
    %c0_i32_0 = arith.constant 0 : i32
    return %arg0, %c0_i32 : i32, i32
  }
  func.func @transform_1(%arg0: i32) -> (i32, i32) {
    %c0_i32 = arith.constant 0 : i32
    %c0_i32_0 = arith.constant 0 : i32
    return %arg0, %c0_i32 : i32, i32
  }
  func.func @transform_2(%arg0: i32) -> (i32, i32) {
    %c0_i32 = arith.constant 0 : i32
    %c0_i32_0 = arith.constant 0 : i32
    return %arg0, %c0_i32 : i32, i32
  }
  func.func @transform_3(%arg0: i32) -> (i32, i32) {
    %c0_i32 = arith.constant 0 : i32
    %c0_i32_0 = arith.constant 0 : i32
    return %arg0, %c0_i32 : i32, i32
  }
  func.func @transform_4(%arg0: i32) -> (i32, i32) {
    %c0_i32 = arith.constant 0 : i32
    %c0_i32_0 = arith.constant 0 : i32
    %c0_i32_1 = arith.constant 0 : i32
    return %c0_i32, %c0_i32_0 : i32, i32
  }
  func.func @transform_5(%arg0: i32) -> (i32, i32) {
    %c0_i32 = arith.constant 0 : i32
    %c0_i32_0 = arith.constant 0 : i32
    %c0_i32_1 = arith.constant 0 : i32
    return %c0_i32, %c0_i32_0 : i32, i32
  }
  func.func @transform_6(%arg0: i32) -> (i32, i32) {
    %c0_i32 = arith.constant 0 : i32
    %c0_i32_0 = arith.constant 0 : i32
    %c0_i32_1 = arith.constant 0 : i32
    return %c0_i32, %c0_i32_0 : i32, i32
  }
  func.func @transform_7(%arg0: i32) -> (i32, i32) {
    %c0_i32 = arith.constant 0 : i32
    %c0_i32_0 = arith.constant 0 : i32
    %c0_i32_1 = arith.constant 0 : i32
    return %c0_i32, %c0_i32_0 : i32, i32
  }
  func.func @transform_8(%arg0: i32) -> (i32, i32) {
    %c0_i32 = arith.constant 0 : i32
    %c0_i32_0 = arith.constant 0 : i32
    %c0_i32_1 = arith.constant 0 : i32
    return %c0_i32, %c0_i32_0 : i32, i32
  }
  func.func @transform_9(%arg0: i32) -> (i32, i32) {
    %c0_i32 = arith.constant 0 : i32
    %c0_i32_0 = arith.constant 0 : i32
    return %arg0, %c0_i32 : i32, i32
  }
}

</mosaic_0001>

<bundles_post_ra>
// kernel: tpu_custom_call.1
= control target key start
LH: loop header
LB: loop body
LE: loop exit
PB: predicated region body
PF: predicated region fallthrough
CT: control target
= control target key end

     0   :  { %v1121_v2 = vmov 1   ;;  %v1122_v3 = vmov 2   ;;  %vm62_vm0 = vcmask 1043456   ;;  %s1437_s0 = inlined_call_operand.vmem [shape: s32[8,8], index: 0, kind: input, shape index: {}]   ;;  %s1438_s1 = inlined_call_operand.vmem [shape: s32[8,8], index: 1, kind: input, shape index: {}]   ;;  %s1439_s2 = inlined_call_operand.vmem [shape: f32[8,64], index: 2, kind: input, shape index: {}]   ;;  %s1440_s3 = inlined_call_operand.vmem [shape: s32[8,7], index: 3, kind: input, shape index: {}]   ;;  %s1441_s4 = inlined_call_operand.vmem [shape: bf16[24,32], index: 4, kind: input, shape index: {}]   ;;  %s1442_s5 = inlined_call_operand.vmem [shape: bf16[50,8], index: 5, kind: input, shape index: {}]   ;;  %s1443_s6 = inlined_call_operand.vmem [shape: bf16[424,32], index: 6, kind: input, shape index: {}]   ;;  %s1444_s7 = inlined_call_operand.vmem [shape: f32[8,32], index: 7, kind: input, shape index: {}]   ;;  %s1445_s8 = inlined_call_operand.vmem [shape: f32[40,128], index: 8, kind: input, shape index: {}]   ;;  %s1446_s9 = inlined_call_operand.hbm [shape: f32[8,128], index: 9, kind: output, shape index: {}]  }
   0x1   :  { %v1186_v0 = vld [vmem:[%s1437_s0] sm:$0xff]  ;;  %1066 = vset.pattern.permute.xlu0 %v1121_v2  ;;  %1068 = vset.pattern.permute.xlu1 %v1122_v3  ;;  %v39_v5 = vld [vmem:[%s1441_s4 + $0x8] sm:$0xf] }
   0x2   :  { %v35_v1 = vld [vmem:[%s1438_s1] sm:$0xff]  ;;  %91 = vperm.xlu0 %1066, %v1186_v0   ;;  %181 = vperm.xlu1 %1068, %v1186_v0   ;;  %v54_v6 = vunpack.c.l.b16 %v39_v5 }
   0x3   :  { %v1192_v4 = vcvt.s32.f32 %v35_v1  ;;  %1070 = vset.pattern.permute.xlu2 %v1121_v2 }
   0x4   :  { %v56_v7 = vpack.c.b16 %v54_v6, %v54_v6 }
   0x5   :  { %114 = vperm.xlu2 %1070, %v1192_v4  }
   0x6   :  { %14 = vsyncpa [#allocation3], 0  ;;  %v1201_v8 = vsel %vm62_vm0, %v56_v7, 0  ;;  %v1123_v9 = vmov 0   ;;  %v1124_v10 = vmov 4   ;;  %v1125_v11 = vmov 6  }
   0x7   :  { %106 = vmatpush.bf16.msra.mxu1 %v1201_v8  ;;  %72 = vmatpush.bf16.msra.mxu0 %v1201_v8  ;;  %v1213_v12 = vld [vmem:[%s1441_s4] sm:$0xff]  ;;  %v1126_v13 = vmov 3   ;;  %v40_v14 = vlaneseq  ;;  %v1127_v17 = vmov 0.0   ;;  %vm58_vm2 = vcmask 195584   ;;  %v1044_v37 = vld [vmem:[%s1443_s6 + $0x98] sm:$0xff]  ;;  %v1043_v39 = vld [vmem:[%s1443_s6 + $0x90] sm:$0xff] }
   0x8   :  { %v646_v23 = vld [vmem:[%s1440_s3] sm:$0xff]  ;;  %v1128_v24 = vmov 7   ;;  %v1129_v26 = vmov 5   ;;  %v1042_v41 = vld [vmem:[%s1443_s6 + $0x88] sm:$0xff]  ;;  %v1028_v46 = vld [vmem:[%s1443_s6 + $0x18] sm:$0xff]  ;;  %vm592_vm7 = vcmask 523264  }
   0x9   :  { %v1224_v15 = vand.u32 127, %v40_v14  ;;  %v654_v25 = vadd.s32 11, %v646_v23  ;;  %v670_v30 = vadd.s32 28, %v646_v23  ;;  %v686_v31 = vadd.s32 41, %v646_v23  ;;  %v1041_v44 = vld [vmem:[%s1443_s6 + $0x80] sm:$0xff]  ;;  %145 = vmatpush.bf16.msra.mxu2 %v1028_v46  ;;  %v1027_v49 = vld [vmem:[%s1443_s6 + $0x10] sm:$0xff] }
   0xa   :  { %1067 = vset.pattern.permute.xlu0 %v1123_v9  ;;  %1069 = vset.pattern.permute.xlu1 %v1124_v10  ;;  %v694_v33 = vadd.s32 46, %v646_v23  ;;  %v662_v38 = vadd.s32 20, %v646_v23  ;;  %v678_v42 = vadd.s32 35, %v646_v23  ;;  %v556_v47 = vld [vmem:[%s1439_s2] sm:$0xff]  ;;  %v1026_v50 = vld [vmem:[%s1443_s6 + $0x8] sm:$0xff]  ;;  %vm135_vm8 = vcmask 261120  }
   0xb   :  { %43 = vperm.xlu0 %1067, %v1186_v0   ;;  %305 = vperm.xlu1 %1069, %v1186_v0   ;;  %v565_v48 = vpack.c.bf16 %v556_v47, %v556_v47  ;;  %v1025_v51 = vld [vmem:[%s1443_s6] sm:$0xff]  ;;  %v1030_v52 = vld [vmem:[%s1443_s6 + $0x28] sm:$0xff]  ;;  %vm735_vm11 = vcmask 1040384   ;;  %s1130_s18 = smov 64   ;;  %s1131_s21 = smov 32  }
   0xc   :  { %107 = vmatpush.bf16.msra.mxu1 %v1213_v12  ;;  %73 = vmatpush.bf16.msra.mxu0 %v1213_v12  ;;  %v1029_v54 = vld [vmem:[%s1443_s6 + $0x20] sm:$0xff]  ;;  %v1034_v58 = vld [vmem:[%s1443_s6 + $0x48] sm:$0xff]  ;;  %s859_s22 = sshll.u32 %s1446_s9, 4  ;;  %s860_s22 = int_to_ptr.hbm [resolvable:$true] %s859_s22 }
   0xd   :  { %1071 = vset.pattern.permute.xlu2 %v1125_v11  ;;  %146 = vmatpush.bf16.msra.mxu2 %v1027_v49  ;;  %v1038_v14 = vld [vmem:[%s1443_s6 + $0x68] sm:$0xff] }
   0xe   :  { %429 = vperm.xlu2 %1071, %v1186_v0   ;;  %173 = vmatpush.bf16.msra.mxu3 %v1026_v50 }
  0x10   :  { %196 = vmatpush.bf16.msrb.mxu0 %v1201_v8  ;;  %234 = vmatpush.bf16.msrb.mxu1 %v1030_v52 }
  0x11   :  { %258 = vmatpush.bf16.msrb.mxu2 %v1201_v8 }
  0x12   :  { %174 = vmatpush.bf16.msra.mxu3 %v1025_v51 }
  0x13   :  { %1072 = vset.pattern.permute.xlu1 %v1126_v13  ;;  %1074 = vset.pattern.permute.xlu0 %v1128_v24 }
  0x14   :  { %243 = vperm.xlu1 %1072, %v1186_v0   ;;  %197 = vmatpush.bf16.msrb.mxu0 %v1213_v12 }
  0x15   :  { %491 = vperm.xlu0 %1074, %v1186_v0   ;;  %259 = vmatpush.bf16.msrb.mxu2 %v1213_v12 }
  0x16   :  { %1073 = vset.pattern.permute.xlu2 %v1129_v26  ;;  %235 = vmatpush.bf16.msrb.mxu1 %v1029_v54 }
  0x17   :  { %367 = vperm.xlu2 %1073, %v1186_v0   ;;  %v1033_v0 = vld [vmem:[%s1443_s6 + $0x40] sm:$0xff] }
  0x1c   :  { %1075 = vset.pattern.permute.xlu1 %v1122_v3 }
  0x1d   :  { %204 = vperm.xlu1 %1075, %v1192_v4   ;;  %1079 = vset.pattern.permute.xlu0 %v1123_v9 }
  0x1e   :  { %648 = vperm.xlu0 %1079, %v646_v23  }
  0x1f   :  { %1076 = vset.pattern.permute.xlu2 %v1124_v10 }
  0x20   :  { %328 = vperm.xlu2 %1076, %v1192_v4  }
  0x25   :  { %1077 = vset.pattern.permute.xlu1 %v1123_v9 }
  0x26   :  { %81 = vperm.xlu1 %1077, %v1192_v4   ;;  %1084 = vset.pattern.permute.xlu0 %v1129_v26 }
  0x27   :  { %688 = vperm.xlu0 %1084, %v686_v31  }
  0x28   :  { %1078 = vset.pattern.permute.xlu2 %v1125_v11 }
  0x29   :  { %452 = vperm.xlu2 %1078, %v1192_v4  }
  0x2e   :  { %1080 = vset.pattern.permute.xlu1 %v1121_v2 }
  0x2f   :  { %656 = vperm.xlu1 %1080, %v654_v25   ;;  %1089 = vset.pattern.permute.xlu0 %v1125_v11 }
  0x31   :  { %1081 = vset.pattern.permute.xlu2 %v1122_v3 }
  0x32   :  { %664 = vperm.xlu2 %1081, %v662_v38  }
  0x37   :  { %1082 = vset.pattern.permute.xlu1 %v1126_v13 }
  0x38   :  { %672 = vperm.xlu1 %1082, %v670_v30  }
  0x3a   :  { %1083 = vset.pattern.permute.xlu2 %v1124_v10  ;;  %v709_v10 = vld [vmem:[%s1442_s5 + $0x18] sm:$0x1] }
  0x3b   :  { %680 = vperm.xlu2 %1083, %v678_v42   ;;  %v1045_v42 = vld [vmem:[%s1443_s6 + $0xa0] sm:$0xff] }
  0x40   :  { %1085 = vset.pattern.permute.xlu1 %v1125_v11 }
  0x41   :  { %696 = vperm.xlu1 %1085, %v694_v33  }
  0x43   :  { %1086 = vset.pattern.permute.xlu2 %v1126_v13 }
  0x44   :  { %266 = vperm.xlu2 %1086, %v1192_v4  }
  0x49   :  { %1087 = vset.pattern.permute.xlu1 %v1129_v26 }
  0x4a   :  { %390 = vperm.xlu1 %1087, %v1192_v4  }
  0x4c   :  { %1088 = vset.pattern.permute.xlu2 %v1128_v24 }
  0x4d   :  { %514 = vperm.xlu2 %1088, %v1192_v4  }
  0x5f   :  { %v115_v35 = vpop.permute.xlu2 %114 }
  0x68   :  { %v430_v40 = vpop.permute.xlu2 %429 }
  0x69   :  { %vm431_vm6 = vcmp.eq.s32.totalorder %v430_v40, %v1224_v15 }
  0x6a   :  { %v938_v43 = vsel %vm431_vm6, 1.0, %v1127_v17  ;;  %vm731_vm6 = vcmask 408576  }
  0x6b   :  { %v434_v45 = vpack.c.bf16 %v938_v43, %v938_v43 }
  0x71   :  { %v368_v60 = vpop.permute.xlu2 %367 }
  0x72   :  { %vm369_vm10 = vcmp.eq.s32.totalorder %v368_v60, %v1224_v15 }
  0x74   :  { %v92_v16 = vpop.permute.xlu0 %91  ;;  %v182_v27 = vpop.permute.xlu1 %181 }
  0x75   :  { %vm93_vm1 = vcmp.eq.s32.totalorder %v92_v16, %v1224_v15  ;;  %vm183_vm4 = vcmp.eq.s32.totalorder %v182_v27, %v1224_v15  ;;  %v723_v16 = vunpack.c.l.b16 %v709_v10 }
  0x76   :  { %v874_v18 = vsel %vm93_vm1, 1.0, %v1127_v17  ;;  %v894_v28 = vsel %vm183_vm4, 1.0, %v1127_v17 }
  0x77   :  { %v96_v19 = vpack.c.bf16 %v874_v18, %v874_v18  ;;  %v186_v29 = vpack.c.bf16 %v894_v28, %v894_v28  ;;  %v1049_v28 = vld [vmem:[%s1442_s5 + $0x10] sm:$0xff] }
  0x79   :  { %875 = vmatmul.msk.bf16.vlgmr.msra.gmra.mxu1 %vm58_vm2, %v96_v19  ;;  %v727_v19 = vpack.c.b16 %v723_v16, %v723_v16 }
  0x7a   :  { %358 = vmatpush.bf16.msra.mxu1 %v1034_v58  ;;  %v329_v4 = vpop.permute.xlu2 %328 }
  0x7b   :  { %v737_v25 = vsel %vm735_vm11, %v727_v19, 0 }
  0x7d   :  { %v44_v20 = vpop.permute.xlu0 %43  ;;  %v306_v32 = vpop.permute.xlu1 %305 }
  0x7e   :  { %vm45_vm3 = vcmp.eq.s32.totalorder %v44_v20, %v1224_v15  ;;  %vm307_vm5 = vcmp.eq.s32.totalorder %v306_v32, %v1224_v15  ;;  %359 = vmatpush.bf16.msra.mxu1 %v1033_v0  ;;  %v1037_v20 = vld [vmem:[%s1443_s6 + $0x60] sm:$0xff]  ;;  %v1031_v0 = vld [vmem:[%s1443_s6 + $0x30] sm:$0xff] }
  0x7f   :  { %v868_v21 = vsel %vm45_vm3, 1.0, %v1127_v17  ;;  %v916_v34 = vsel %vm307_vm5, 1.0, %v1127_v17 }
  0x80   :  { %v48_v22 = vpack.c.bf16 %v868_v21, %v868_v21  ;;  %v310_v36 = vpack.c.bf16 %v916_v34, %v916_v34  ;;  %v1048_v34 = vld [vmem:[%s1442_s5 + $0x8] sm:$0xff] }
  0x82   :  { %873 = vmatmul.msk.bf16.vlgmr.msra.gmra.mxu0 %vm58_vm2, %v48_v22 }
  0x83   :  { %320 = vmatpush.bf16.msra.mxu0 %v1201_v8  ;;  %v1315_v9 = vpop.permute.xlu2 %452 }
  0x86   :  { %v244_v53 = vpop.permute.xlu1 %243 }
  0x87   :  { %321 = vmatpush.bf16.msra.mxu0 %v1213_v12  ;;  %vm245_vm9 = vcmp.eq.s32.totalorder %v244_v53, %v1224_v15  ;;  %v492_v7 = vpop.permute.xlu0 %491 }
  0x88   :  { %v905_v3 = vsel %vm245_vm9, 1.0, %v1127_v17  ;;  %vm493_vm15 = vcmp.eq.s32.totalorder %v492_v7, %v1224_v15 }
  0x89   :  { %v248_v5 = vpack.c.bf16 %v905_v3, %v905_v3 }
  0x8c   :  { %v665_v24 = vpop.permute.xlu2 %664 }
  0x8d   :  { %vm666_vm14 = vcmp.eq.s32.totalorder %v665_v24, %v1224_v15 }
  0x8e   :  { %v988_v32 = vsel %vm666_vm14, 1.0, %v1127_v17 }
  0x8f   :  { %v205_v55 = vpop.permute.xlu1 %204 }
  0x92   :  { %895 = vmatmul.msk.bf16.vlgmr.msrb.gmra.mxu0 %vm58_vm2, %v186_v29 }
  0x93   :  { %444 = vmatpush.bf16.msrb.mxu0 %v1201_v8 }
  0x97   :  { %445 = vmatpush.bf16.msrb.mxu0 %v1213_v12 }
  0x98   :  { %v82_v61 = vpop.permute.xlu1 %81 }
  0xa1   :  { %v657_v21 = vpop.permute.xlu1 %656 }
  0xa2   :  { %917 = vmatmul.msk.bf16.vlgmr.msra.gmra.mxu0 %vm58_vm2, %v310_v36  ;;  %vm658_vm12 = vcmp.eq.s32.totalorder %v657_v21, %v1224_v15 }
  0xa3   :  { %600 = vmatpush.bf16.msra.mxu0 %v1044_v37  ;;  %v987_v26 = vsel %vm658_vm12, 1.0, %v1127_v17  ;;  %v681_v37 = vpop.permute.xlu2 %680 }
  0xa4   :  { %vm682_vm3 = vcmp.eq.s32.totalorder %v681_v37, %v1224_v15 }
  0xa5   :  { %v990_v47 = vsel %vm682_vm3, 1.0, %v1127_v17 }
  0xa7   :  { %601 = vmatpush.bf16.msra.mxu0 %v1043_v39  ;;  %v949_v39 = vsel %vm493_vm15, 1.0, %v1127_v17 }
  0xaa   :  { %v673_v33 = vpop.permute.xlu1 %672 }
  0xab   :  { %602 = vmatpush.bf16.msra.mxu0 %v1042_v41  ;;  %vm674_vm1 = vcmp.eq.s32.totalorder %v673_v33, %v1224_v15  ;;  %v1047_v41 = vld [vmem:[%s1442_s5] sm:$0xff]  ;;  %v267_v7 = vpop.permute.xlu2 %266 }
  0xac   :  { %v989_v40 = vsel %vm674_vm1, 1.0, %v1127_v17 }
  0xaf   :  { %603 = vmatpush.bf16.msra.mxu0 %v1041_v44  ;;  %v496_v44 = vpack.c.bf16 %v949_v39, %v949_v39 }
  0xb2   :  { %939 = vmatmul.msk.bf16.vlgmr.msrb.gmra.mxu0 %vm58_vm2, %v434_v45 }
  0xc2   :  { %976 = vmatmul.msk.bf16.vlgmr.msra.gmra.mxu0 %vm592_vm7, %v565_v48  ;;  %v697_v48 = vpop.permute.xlu1 %696 }
  0xc3   :  { %vm698_vm5 = vcmp.eq.s32.totalorder %v697_v48, %v1224_v15  ;;  %v1051_v48 = vld [vmem:[%s1443_s6 + $0xb8] sm:$0xff] }
  0xc4   :  { %v992_v54 = vsel %vm698_vm5, 1.0, %v1127_v17 }
  0xca   :  { %v391_v21 = vpop.permute.xlu1 %390 }
  0xf6   :  { %v109_v56 = vpop.f32.mrf.mxu1 }
  0xf7   :  { %v117_v57 = vmul.f32 %v115_v35, %v109_v56  ;;  %v1046_v35 = vld [vmem:[%s1443_s6 + $0xa8] sm:$0xff] }
  0xf9   :  { %v122_v59 = vpack.c.bf16 %v117_v57, %v117_v57 }
  0xfb   :  { %884 = vmatmul.msk.bf16.vlgmr.msra.gmra.mxu2 %vm135_vm8, %v122_v59  ;;  %v1090_v59 = vld [vmem:[%s1444_s7 + $0x1] ss:$0 sm:$0xff] }
  0xfc   :  { %382 = vmatpush.bf16.msra.mxu2 %v1201_v8 }
  0xfe   :  { %v111_v62 = vpop.f32.mrf.mxu1 }
  0xff   :  { %v75_v63 = vpop.f32.mrf.mxu0 }
 0x100   :  { %v84_v1 = vmul.f32 %v82_v61, %v75_v63  ;;  %383 = vmatpush.bf16.msra.mxu2 %v1213_v12 }
 0x102   :  { %v89_v2 = vpack.c.bf16 %v84_v1, %v84_v1  ;;  %v1036_v1 = vld [vmem:[%s1443_s6 + $0x58] sm:$0xff] }
 0x104   :  { %893 = vmatmul.msk.bf16.vlgmr.msra.gmra.mxu3 %vm135_vm8, %v89_v2  ;;  %v1035_v2 = vld [vmem:[%s1443_s6 + $0x50] sm:$0xff] }
 0x107   :  { %v77_v6 = vpop.f32.mrf.mxu0 }
 0x10b   :  { %906 = vmatmul.msk.bf16.vlgmr.msrb.gmra.mxu2 %vm58_vm2, %v248_v5 }
 0x10c   :  { %506 = vmatpush.bf16.msrb.mxu2 %v1201_v8  ;;  %v927_v8 = vsel %vm369_vm10, 1.0, %v1127_v17 }
 0x10d   :  { %v372_v22 = vpack.c.bf16 %v927_v8, %v927_v8  ;;  %v1039_v8 = vld [vmem:[%s1443_s6 + $0x70] sm:$0xff] }
 0x10f   :  { %v199_v11 = vpop.f32.mrf.mxu0 }
 0x110   :  { %v207_v13 = vmul.f32 %v205_v55, %v199_v11  ;;  %507 = vmatpush.bf16.msrb.mxu2 %v1213_v12  ;;  %v649_v12 = vpop.permute.xlu0 %648 }
 0x111   :  { %vm650_vm13 = vcmp.eq.s32.totalorder %v649_v12, %v1224_v15 }
 0x112   :  { %v212_v18 = vpack.c.bf16 %v207_v13, %v207_v13  ;;  %v986_v27 = vsel %vm650_vm13, 1.0, %v1127_v17  ;;  %v1040_v13 = vld [vmem:[%s1443_s6 + $0x78] sm:$0xff] }
 0x113   :  { %v661_v30 = vadd.f32 %v987_v26, %v986_v27  ;;  %v515_v27 = vpop.permute.xlu2 %514 }
 0x114   :  { %904 = vmatmul.msk.bf16.vlgmr.msrb.gmra.mxu1 %vm135_vm8, %v212_v18 }
 0x115   :  { %482 = vmatpush.bf16.msrb.mxu1 %v1038_v14  ;;  %v669_v38 = vadd.f32 %v988_v32, %v661_v30 }
 0x117   :  { %v201_v23 = vpop.f32.mrf.mxu0  ;;  %v677_v46 = vadd.f32 %v989_v40, %v669_v38 }
 0x118   :  { %v689_v43 = vpop.permute.xlu0 %688 }
 0x119   :  { %483 = vmatpush.bf16.msrb.mxu1 %v1037_v20  ;;  %vm690_vm4 = vcmp.eq.s32.totalorder %v689_v43, %v1224_v15  ;;  %v685_v49 = vadd.f32 %v990_v47, %v677_v46  ;;  %v1052_v46 = vld [vmem:[%s1443_s6 + $0xc0] sm:$0xff] }
 0x11a   :  { %v991_v50 = vsel %vm690_vm4, 1.0, %v1127_v17  ;;  %v1032_v17 = vld [vmem:[%s1443_s6 + $0x38] sm:$0xff] }
 0x11b   :  { %928 = vmatmul.msk.bf16.vlgmr.msra.gmra.mxu2 %vm58_vm2, %v372_v22  ;;  %v693_v52 = vadd.f32 %v991_v50, %v685_v49  ;;  %296 = vmatpush.bf16.msrb.mxu3 %v1032_v17  ;;  %v1050_v49 = vld [vmem:[%s1443_s6 + $0xb0] sm:$0xff] }
 0x11c   :  { %743 = vmatpush.bf16.msra.mxu2 %v737_v25 }
 0x11d   :  { %v701_v56 = vadd.f32 %v992_v54, %v693_v52  ;;  %v824_v52 = vld [vmem:[%s1445_s8 + $0x10] sm:$0xff] }
 0x11f   :  { %v323_v29 = vpop.f32.mrf.mxu0  ;;  %v702_v57 = vpack.c.bf16 %v701_v56, %v701_v56  ;;  %297 = vmatpush.bf16.msrb.mxu3 %v1031_v0 }
 0x120   :  { %v331_v31 = vmul.f32 %v329_v4, %v323_v29  ;;  %744 = vmatpush.bf16.msra.mxu2 %v1049_v28 }
 0x122   :  { %v336_v36 = vpack.c.bf16 %v331_v31, %v331_v31 }
 0x123   :  { %420 = vmatpush.bf16.msra.mxu3 %v1036_v1 }
 0x124   :  { %926 = vmatmul.msk.bf16.vlgmr.msra.gmra.mxu1 %vm135_vm8, %v336_v36  ;;  %745 = vmatpush.bf16.msra.mxu2 %v1048_v34 }
 0x125   :  { %638 = vmatpush.bf16.msra.mxu1 %v1046_v35  ;;  %v1091_v35 = vld [vmem:[%s1444_s7 + $0x2] ss:$0 sm:$0xff] }
 0x127   :  { %v325_v45 = vpop.f32.mrf.mxu0  ;;  %421 = vmatpush.bf16.msra.mxu3 %v1035_v2 }
 0x128   :  { %746 = vmatpush.bf16.msra.mxu2 %v1047_v41  ;;  %v771_v41 = vld [vmem:[%s1443_s6 + $0xd0] sm:$0xf]  ;;  %v1053_v45 = vld [vmem:[%s1443_s6 + $0xc8] sm:$0xff] }
 0x129   :  { %639 = vmatpush.bf16.msra.mxu1 %v1045_v42  ;;  %v791_v42 = vunpack.c.l.b16 %v771_v41 }
 0x12b   :  { %950 = vmatmul.msk.bf16.vlgmr.msrb.gmra.mxu2 %vm58_vm2, %v496_v44  ;;  %v796_v43 = vpack.c.b16 %v791_v42, %v791_v42 }
 0x12d   :  { %v806_v44 = vsel %vm62_vm0, %v796_v43, 0  ;;  %vm801_vm0 = vcmask 588800  }
 0x12f   :  { %v447_v51 = vpop.f32.mrf.mxu0 }
 0x130   :  { %v455_v53 = vmul.f32 %v1315_v9, %v447_v51  ;;  %v825_v51 = vld [vmem:[%s1445_s8 + $0x18] sm:$0xff] }
 0x131   :  { %843 = vmatpush.msrb.mxu0 %v825_v51 }
 0x132   :  { %v460_v55 = vpack.c.bf16 %v455_v53, %v455_v53  ;;  %v823_v53 = vld [vmem:[%s1445_s8 + $0x8] sm:$0xff] }
 0x133   :  { %844 = vmatpush.msrb.mxu0 %v824_v52 }
 0x134   :  { %948 = vmatmul.msk.bf16.vlgmr.msrb.gmra.mxu1 %vm135_vm8, %v460_v55 }
 0x135   :  { %845 = vmatpush.msrb.mxu0 %v823_v53 }
 0x137   :  { %v449_v58 = vpop.f32.mrf.mxu0 }
 0x13b   :  { %1005 = vmatmul.msk.bf16.vlgmr.msra.gmra.mxu2 %vm731_vm6, %v702_v57 }
 0x13f   :  { %v605_v60 = vpop.f32.mrf.mxu0 }
 0x140   :  { %v606_v15 = vadd.f32 %v1090_v59, %v605_v60  ;;  %v1092_v60 = vld [vmem:[%s1444_s7] ss:$0 sm:$0xff] }
 0x142   :  { %v609_v61 = vmax.f32 %v606_v15, 0.0 }
 0x144   :  { %v614_v62 = vpack.c.bf16 %v609_v61, %v609_v61 }
 0x146   :  { %985 = vmatmul.msk.bf16.vlgmr.msra.gmra.mxu1 %vm135_vm8, %v614_v62 }
 0x147   :  { %v607_v63 = vpop.f32.mrf.mxu0 }
 0x17e   :  { %v148_v3 = vpop.f32.mrf.mxu2 }
 0x186   :  { %v150_v4 = vpop.f32.mrf.mxu2 }
 0x187   :  { %v176_v5 = vpop.f32.mrf.mxu3 }
 0x188   :  { %v177_v6 = vadd.f32 %v176_v5, %v148_v3  ;;  %v822_v5 = vld [vmem:[%s1445_s8] sm:$0xff] }
 0x189   :  { %846 = vmatpush.msrb.mxu0 %v822_v5 }
 0x18e   :  { %v261_v9 = vpop.f32.mrf.mxu2 }
 0x18f   :  { %v269_v10 = vmul.f32 %v267_v7, %v261_v9  ;;  %v178_v11 = vpop.f32.mrf.mxu3 }
 0x191   :  { %v274_v14 = vpack.c.bf16 %v269_v10, %v269_v10  ;;  %v237_v16 = vpop.f32.mrf.mxu1 }
 0x192   :  { %v241_v18 = vadd.f32 %v237_v16, %v177_v6  ;;  %v1093_v6 = vld [vmem:[%s1444_s7 + $0x3] ss:$0 sm:$0xff] }
 0x193   :  { %915 = vmatmul.msk.bf16.vlgmr.msrb.gmra.mxu3 %vm135_vm8, %v274_v14 }
 0x194   :  { %544 = vmatpush.bf16.msrb.mxu3 %v1040_v13  ;;  %v1094_v13 = vld [vmem:[%s1445_s8 + $0x20] ss:$0 sm:$0xff] }
 0x196   :  { %v263_v19 = vpop.f32.mrf.mxu2 }
 0x198   :  { %545 = vmatpush.bf16.msrb.mxu3 %v1039_v8 }
 0x199   :  { %v239_v20 = vpop.f32.mrf.mxu1 }
 0x19e   :  { %v385_v12 = vpop.f32.mrf.mxu2 }
 0x19f   :  { %v393_v22 = vmul.f32 %v391_v21, %v385_v12 }
 0x1a1   :  { %v398_v23 = vpack.c.bf16 %v393_v22, %v393_v22  ;;  %v361_v24 = vpop.f32.mrf.mxu1 }
 0x1a3   :  { %937 = vmatmul.msk.bf16.vlgmr.msra.gmra.mxu3 %vm135_vm8, %v398_v23 }
 0x1a4   :  { %811 = vmatpush.bf16.msra.mxu3 %v806_v44 }
 0x1a6   :  { %v387_v25 = vpop.f32.mrf.mxu2 }
 0x1a8   :  { %812 = vmatpush.bf16.msra.mxu3 %v1053_v45 }
 0x1a9   :  { %v363_v26 = vpop.f32.mrf.mxu1 }
 0x1ac   :  { %813 = vmatpush.bf16.msra.mxu3 %v1052_v46 }
 0x1ae   :  { %v509_v28 = vpop.f32.mrf.mxu2 }
 0x1af   :  { %v517_v29 = vmul.f32 %v515_v27, %v509_v28 }
 0x1b0   :  { %814 = vmatpush.bf16.msra.mxu3 %v1051_v48 }
 0x1b1   :  { %v522_v30 = vpack.c.bf16 %v517_v29, %v517_v29  ;;  %v485_v31 = vpop.f32.mrf.mxu1 }
 0x1b3   :  { %959 = vmatmul.msk.bf16.vlgmr.msrb.gmra.mxu3 %vm135_vm8, %v522_v30 }
 0x1b4   :  { %815 = vmatpush.bf16.msra.mxu3 %v1050_v49 }
 0x1b6   :  { %v511_v32 = vpop.f32.mrf.mxu2 }
 0x1b9   :  { %v487_v33 = vpop.f32.mrf.mxu1 }
 0x1be   :  { %v748_v34 = vpop.f32.mrf.mxu2 }
 0x1bf   :  { %757 = vrot.lane.b32.xlu1 %v748_v34, %s1130_s18  ;;  %s1132_s18 = smov [#allocation2]  }
 0x1c0   :  { %s857_s19 = sshll.u32 %s1132_s18, 4  ;;  %s858_s19 = int_to_ptr.vmem [resolvable:$true] %s857_s19 }
 0x1c3   :  { %v641_v36 = vpop.f32.mrf.mxu1 }
 0x1c4   :  { %v642_v37 = vadd.f32 %v1091_v35, %v641_v36 }
 0x1c6   :  { %v645_v38 = vmax.f32 %v642_v37, 0.0  ;;  %v750_v39 = vpop.f32.mrf.mxu2 }
 0x1c8   :  { %753 = vrot.lane.b32.xlu0 %v645_v38, %s1131_s21 }
 0x1cb   :  { %v643_v40 = vpop.f32.mrf.mxu1 }
 0x216   :  { %v299_v47 = vpop.f32.mrf.mxu3 }
 0x217   :  { %v303_v55 = vadd.f32 %v299_v47, %v241_v18 }
 0x219   :  { %v365_v57 = vadd.f32 %v361_v24, %v303_v55 }
 0x21e   :  { %v301_v50 = vpop.f32.mrf.mxu3 }
 0x226   :  { %v423_v54 = vpop.f32.mrf.mxu3 }
 0x227   :  { %v427_v58 = vadd.f32 %v423_v54, %v365_v57 }
 0x229   :  { %v489_v59 = vadd.f32 %v485_v31, %v427_v58 }
 0x22e   :  { %v425_v56 = vpop.f32.mrf.mxu3 }
 0x231   :  { %v758_v0 = vpop.permute.xlu1 %757 }
 0x236   :  { %v547_v15 = vpop.f32.mrf.mxu3 }
 0x237   :  { %v551_v61 = vadd.f32 %v547_v15, %v489_v59 }
 0x239   :  { %v554_v62 = vadd.f32 %v1092_v60, %v551_v61 }
 0x23a   :  { %v754_v63 = vpop.permute.xlu0 %753 }
 0x23b   :  { %v555_v17 = vmax.f32 %v554_v62, 0.0 }
 0x23d   :  { %v760_v1 = vsel %vm135_vm8, %v555_v17, %v754_v63 }
 0x23e   :  { %v761_v2 = vsel %vm592_vm7, %v760_v1, %v758_v0  ;;  %v549_v3 = vpop.f32.mrf.mxu3 }
 0x23f   :  { %v762_v4 = vpack.c.bf16 %v761_v2, %v761_v2 }
 0x241   :  { %1022 = vmatmul.msk.bf16.vlgmr.msra.gmra.mxu3 %vm801_vm0, %v762_v4 }
 0x2c4   :  { %v817_v7 = vpop.f32.mrf.mxu3 }
 0x2c5   :  { %v818_v9 = vadd.f32 %v1093_v6, %v817_v7 }
 0x2c7   :  { %v821_v10 = vmax.f32 %v818_v9, 0.0 }
 0x2c9   :  { %1023 = vmatmul.msk.f32.vlgmr.msrb.gmra.mxu0 %vm135_vm8, %v821_v10 }
 0x2cc   :  { %v819_v11 = vpop.f32.mrf.mxu3 }
 0x346   :  { %v848_v14 = vpop.f32.mrf.mxu0 }
 0x347   :  { %v849_v16 = vadd.f32 %v1094_v13, %v848_v14 }
 0x349   :  { %851 = vst [vmem:[#allocation2] sm:$0xff] %v849_v16 }
 0x34a   :  { %862 = dma.vmem_to_hbm [thread:$0]  %s858_s19, 128, %s860_s22, [#allocation3]  }
 0x34b   :  { %1119 = dma.done.wait [#allocation3], 128  }
 0x34c   :  { %1120 = vsyncadd [#allocation3], 4294967168 }
 0x34d   :  { %867 = vsyncpa [#allocation3], 1 }

</bundles_post_ra>
